<compile_context>
chip_gen: v6e
topology: v6e:2x2x1
jax: 0.10.0
libtpu: 0.0.40
codegen_flags: <defaults>
</compile_context>

<pallas_src>
import functools
import math

import jax
import jax.numpy as jnp
from jax import lax
from jax.experimental import pallas as pl
from jax.experimental.pallas import tpu as pltpu


# ----------------------------- Pallas kernel --------------------------------

def _mha_second_kernel(x_ref, enc_ref, wq_ref, bq_ref, wkv_ref, bkv_ref, o_ref,
                       *, num_heads, mxu_dtype):
    # Block shapes (leading batch dim squeezed away):
    #   x_ref, enc_ref, o_ref : (S, D)
    #   wq_ref : (D, D)    bq_ref : (1, D)
    #   wkv_ref: (D, 2D)   bkv_ref: (1, 2D)
    S, D = x_ref.shape
    Dh = D // num_heads
    inv_sqrt_dh = 1.0 / math.sqrt(Dh)

    x = x_ref[...].astype(mxu_dtype)
    enc = enc_ref[...].astype(mxu_dtype)

    # Fused Q and KV projections, f32 accumulation on the MXU.
    q = jnp.dot(x, wq_ref[...].astype(mxu_dtype),
                preferred_element_type=jnp.float32) + bq_ref[...]
    kv = jnp.dot(enc, wkv_ref[...].astype(mxu_dtype),
                 preferred_element_type=jnp.float32) + bkv_ref[...]

    # Fold the 1/sqrt(d_k) scale into Q once.
    q = q * inv_sqrt_dh

    # Per-head attention; heads live along the lane axis of q / kv.  The small
    # unrolled Python loop keeps everything as plain 2-D MXU matmuls.
    head_outs = []
    for h in range(num_heads):
        q_h = q[:, h * Dh:(h + 1) * Dh].astype(mxu_dtype)
        k_h = kv[:, h * 2 * Dh: h * 2 * Dh + Dh].astype(mxu_dtype)
        v_h = kv[:, h * 2 * Dh + Dh:(h + 1) * 2 * Dh].astype(mxu_dtype)

        # Q @ K^T by contracting the last dims directly (no explicit transpose).
        s = lax.dot_general(q_h, k_h, (((1,), (1,)), ((), ())),
                            preferred_element_type=jnp.float32)      # (S, S)
        m = jnp.max(s, axis=-1, keepdims=True)
        e = jnp.exp(s - m)                                           # EUP
        l = jnp.sum(e, axis=-1, keepdims=True)
        p = e * pl.reciprocal(l, approx=True)                        # EUP recip
        head_outs.append(jnp.dot(p.astype(mxu_dtype), v_h,
                                 preferred_element_type=jnp.float32))

    # Single lane-dense (S, D) store; heads packed along the lane axis in the
    # same layout as the PyTorch reshape(B, S, H * Dh).
    o_ref[...] = jnp.concatenate(head_outs, axis=-1).astype(o_ref.dtype)


# ----------------------------- Module wrapper --------------------------------

def init_params(key, d_model):
    """PyTorch Linear shapes: weight (out, in), bias (out)."""
    ks = jax.random.split(key, 6)
    s = 1.0 / math.sqrt(d_model)
    return {
        "w_q":   jax.random.uniform(ks[0], (d_model, d_model), jnp.float32, -s, s),
        "b_q":   jax.random.uniform(ks[1], (d_model,), jnp.float32, -s, s),
        "w_kv":  jax.random.uniform(ks[2], (2 * d_model, d_model), jnp.float32, -s, s),
        "b_kv":  jax.random.uniform(ks[3], (2 * d_model,), jnp.float32, -s, s),
        "w_out": jax.random.uniform(ks[4], (d_model, d_model), jnp.float32, -s, s),
        "b_out": jax.random.uniform(ks[5], (d_model,), jnp.float32, -s, s),
    }


def multi_head_attention_second(x, encoder_output, params, num_heads,
                                mxu_dtype=jnp.float32):
    """Matches MultiHeadAttentionSecond.forward: returns `values` (B, S, d_model).

    Set mxu_dtype=jnp.bfloat16 on v6e/v7x for ~2x MXU throughput (f32 accum kept).
    """
    B, S, D = x.shape
    assert D % num_heads == 0

    w_q_t = params["w_q"].T            # (D, D)
    w_kv_t = params["w_kv"].T          # (D, 2D)
    b_q = params["b_q"][None, :]       # (1, D)
    b_kv = params["b_kv"][None, :]     # (1, 2D)

    kernel = functools.partial(_mha_second_kernel,
                               num_heads=num_heads, mxu_dtype=mxu_dtype)

    return pl.pallas_call(
        kernel,
        out_shape=jax.ShapeDtypeStruct((B, S, D), jnp.float32),
        grid=(B,),
        in_specs=[
            pl.BlockSpec((pl.Squeezed(), S, D), lambda b: (b, 0, 0)),   # x
            pl.BlockSpec((pl.Squeezed(), S, D), lambda b: (b, 0, 0)),   # encoder_output
            pl.BlockSpec((D, D), lambda b: (0, 0)),                     # w_q^T (resident)
            pl.BlockSpec((1, D), lambda b: (0, 0)),                     # b_q
            pl.BlockSpec((D, 2 * D), lambda b: (0, 0)),                 # w_kv^T (resident)
            pl.BlockSpec((1, 2 * D), lambda b: (0, 0)),                 # b_kv
        ],
        out_specs=pl.BlockSpec((pl.Squeezed(), S, D), lambda b: (b, 0, 0)),
        compiler_params=pltpu.CompilerParams(
            dimension_semantics=("parallel",),          # shards batch over TCs (v7x)
            vmem_limit_bytes=32 * 1024 * 1024,          # safe on v5e/v6e/v7x
        ),
    )(x, encoder_output, w_q_t, b_q, w_kv_t, b_kv)

    # NOTE: the PyTorch module computes `out = self.linear_layer(values)` but
    # RETURNS `values`; the final projection is dead code and is omitted here.


# ----------------------------- Reference (pure JAX) --------------------------

def reference(x, encoder_output, params, num_heads):
    B, S, D = x.shape
    Dh = D // num_heads
    kv = encoder_output @ params["w_kv"].T + params["b_kv"]
    q = x @ params["w_q"].T + params["b_q"]
    kv = kv.reshape(B, S, num_heads, 2 * Dh).transpose(0, 2, 1, 3)
    q = q.reshape(B, S, num_heads, Dh).transpose(0, 2, 1, 3)
    k, v = kv[..., :Dh], kv[..., Dh:]
    scaled = jnp.einsum("bhqd,bhkd->bhqk", q, k) / math.sqrt(Dh)
    attn = jax.nn.softmax(scaled, axis=-1)
    values = jnp.einsum("bhqk,bhkd->bhqd", attn, v)
    return values.transpose(0, 2, 1, 3).reshape(B, S, D)


# ----------------------------------- main ------------------------------------

if __name__ == "__main__":
    B, S, d_model, num_heads = 2, 8, 32, 4

    key = jax.random.PRNGKey(0)
    kx, ke, kp = jax.random.split(key, 3)
    x = jax.random.normal(kx, (B, S, d_model), jnp.float32)
    enc = jax.random.normal(ke, (B, S, d_model), jnp.float32)
    params = init_params(kp, d_model)

    out = multi_head_attention_second(x, enc, params, num_heads)
    out = jax.block_until_ready(out)

    ref = reference(x, enc, params, num_heads)
    assert out.shape == (B, S, d_model)
    # 2e-3 tolerance: approx EUP reciprocal in the softmax is the dominant delta.
    assert jnp.allclose(out, ref, atol=2e-3, rtol=2e-3), float(jnp.max(jnp.abs(out - ref)))

    print("KERNEL_OK")
</pallas_src>

<mosaic_0001>
module attributes {stable_mosaic.version = 11 : i64} {
  func.func @_mha_second_kernel(%arg0: i32, %arg1: memref<1x8x32xf32, #tpu.memory_space<vmem>>, %arg2: memref<1x8x32xf32, #tpu.memory_space<vmem>>, %arg3: memref<32x32xf32, #tpu.memory_space<vmem>>, %arg4: memref<1x32xf32, #tpu.memory_space<vmem>>, %arg5: memref<32x64xf32, #tpu.memory_space<vmem>>, %arg6: memref<1x64xf32, #tpu.memory_space<vmem>>, %arg7: memref<1x8x32xf32, #tpu.memory_space<vmem>>) attributes {dimension_semantics = [#tpu.dimension_semantics<parallel>], iteration_bounds = array<i64: 2>, scalar_prefetch = 0 : i64, scratch_operands = 0 : i64, tpu.core_type = #tpu.core_type<tc>, window_params = [{transform_indices = @transform_0, window_bounds = array<i64: 1, 8, 32>}, {transform_indices = @transform_1, window_bounds = array<i64: 1, 8, 32>}, {pipeline_mode = #tpu.pipeline_mode<synchronous>, transform_indices = @transform_2, window_bounds = array<i64: 32, 32>}, {pipeline_mode = #tpu.pipeline_mode<synchronous>, transform_indices = @transform_3, window_bounds = array<i64: 1, 32>}, {pipeline_mode = #tpu.pipeline_mode<synchronous>, transform_indices = @transform_4, window_bounds = array<i64: 32, 64>}, {pipeline_mode = #tpu.pipeline_mode<synchronous>, transform_indices = @transform_5, window_bounds = array<i64: 1, 64>}, {transform_indices = @transform_6, window_bounds = array<i64: 1, 8, 32>}]} {
    %c0 = arith.constant 0 : index
    %c0_0 = arith.constant 0 : index
    %c0_1 = arith.constant 0 : index
    %0 = vector.load %arg1[%c0, %c0_0, %c0_1] : memref<1x8x32xf32, #tpu.memory_space<vmem>>, vector<1x8x32xf32>
    %1 = vector.shape_cast %0 : vector<1x8x32xf32> to vector<8x32xf32>
    %c0_2 = arith.constant 0 : index
    %c0_3 = arith.constant 0 : index
    %c0_4 = arith.constant 0 : index
    %2 = vector.load %arg2[%c0_2, %c0_3, %c0_4] : memref<1x8x32xf32, #tpu.memory_space<vmem>>, vector<1x8x32xf32>
    %3 = vector.shape_cast %2 : vector<1x8x32xf32> to vector<8x32xf32>
    %c0_5 = arith.constant 0 : index
    %c0_6 = arith.constant 0 : index
    %4 = vector.load %arg3[%c0_5, %c0_6] : memref<32x32xf32, #tpu.memory_space<vmem>>, vector<32x32xf32>
    %cst = arith.constant dense<0.000000e+00> : vector<8x32xf32>
    %5 = tpu.matmul %1, %4, %cst {dimension_numbers = #tpu.dot_dimension_numbers<[1], [0], [0], [1], [0, 0, 1, 1], [], []>} : vector<8x32xf32>, vector<32x32xf32>, vector<8x32xf32> -> vector<8x32xf32>
    %c0_7 = arith.constant 0 : index
    %c0_8 = arith.constant 0 : index
    %6 = vector.load %arg4[%c0_7, %c0_8] : memref<1x32xf32, #tpu.memory_space<vmem>>, vector<1x32xf32>
    %7 = vector.broadcast %6 : vector<1x32xf32> to vector<8x32xf32>
    %8 = arith.addf %5, %7 : vector<8x32xf32>
    %c0_9 = arith.constant 0 : index
    %c0_10 = arith.constant 0 : index
    %9 = vector.load %arg5[%c0_9, %c0_10] : memref<32x64xf32, #tpu.memory_space<vmem>>, vector<32x64xf32>
    %cst_11 = arith.constant dense<0.000000e+00> : vector<8x64xf32>
    %10 = tpu.matmul %3, %9, %cst_11 {dimension_numbers = #tpu.dot_dimension_numbers<[1], [0], [0], [1], [0, 0, 1, 1], [], []>} : vector<8x32xf32>, vector<32x64xf32>, vector<8x64xf32> -> vector<8x64xf32>
    %c0_12 = arith.constant 0 : index
    %c0_13 = arith.constant 0 : index
    %11 = vector.load %arg6[%c0_12, %c0_13] : memref<1x64xf32, #tpu.memory_space<vmem>>, vector<1x64xf32>
    %12 = vector.broadcast %11 : vector<1x64xf32> to vector<8x64xf32>
    %13 = arith.addf %10, %12 : vector<8x64xf32>
    %cst_14 = arith.constant 0.353553385 : f32
    %14 = vector.broadcast %cst_14 : f32 to vector<8x32xf32>
    %15 = arith.mulf %8, %14 : vector<8x32xf32>
    %16 = vector.extract_strided_slice %15 {offsets = [0, 0], sizes = [8, 8], strides = [1, 1]} : vector<8x32xf32> to vector<8x8xf32>
    %17 = vector.extract_strided_slice %13 {offsets = [0, 0], sizes = [8, 8], strides = [1, 1]} : vector<8x64xf32> to vector<8x8xf32>
    %18 = vector.extract_strided_slice %13 {offsets = [0, 8], sizes = [8, 8], strides = [1, 1]} : vector<8x64xf32> to vector<8x8xf32>
    %cst_15 = arith.constant dense<0.000000e+00> : vector<8x8xf32>
    %19 = tpu.matmul %16, %17, %cst_15 {dimension_numbers = #tpu.dot_dimension_numbers<[1], [1], [0], [0], [0, 0, 1, 0], [], []>} : vector<8x8xf32>, vector<8x8xf32>, vector<8x8xf32> -> vector<8x8xf32>
    %cst_16 = arith.constant dense<0xFF800000> : vector<8xf32>
    %20 = vector.multi_reduction <maximumf>, %19, %cst_16 [1] : vector<8x8xf32> to vector<8xf32>
    %21 = vector.shape_cast %20 : vector<8xf32> to vector<8x1xf32>
    %22 = vector.broadcast %21 : vector<8x1xf32> to vector<8x8xf32>
    %23 = arith.subf %19, %22 : vector<8x8xf32>
    %24 = math.exp %23 : vector<8x8xf32>
    %cst_17 = arith.constant dense<0.000000e+00> : vector<8xf32>
    %25 = vector.multi_reduction <add>, %24, %cst_17 [1] : vector<8x8xf32> to vector<8xf32>
    %26 = vector.shape_cast %25 : vector<8xf32> to vector<8x1xf32>
    %27 = tpu.reciprocal %26 {approx = true} : vector<8x1xf32> -> vector<8x1xf32>
    %28 = vector.broadcast %27 : vector<8x1xf32> to vector<8x8xf32>
    %29 = arith.mulf %24, %28 : vector<8x8xf32>
    %cst_18 = arith.constant dense<0.000000e+00> : vector<8x8xf32>
    %30 = tpu.matmul %29, %18, %cst_18 {dimension_numbers = #tpu.dot_dimension_numbers<[1], [0], [0], [1], [0, 0, 1, 1], [], []>} : vector<8x8xf32>, vector<8x8xf32>, vector<8x8xf32> -> vector<8x8xf32>
    %31 = vector.extract_strided_slice %15 {offsets = [0, 8], sizes = [8, 8], strides = [1, 1]} : vector<8x32xf32> to vector<8x8xf32>
    %32 = vector.extract_strided_slice %13 {offsets = [0, 16], sizes = [8, 8], strides = [1, 1]} : vector<8x64xf32> to vector<8x8xf32>
    %33 = vector.extract_strided_slice %13 {offsets = [0, 24], sizes = [8, 8], strides = [1, 1]} : vector<8x64xf32> to vector<8x8xf32>
    %cst_19 = arith.constant dense<0.000000e+00> : vector<8x8xf32>
    %34 = tpu.matmul %31, %32, %cst_19 {dimension_numbers = #tpu.dot_dimension_numbers<[1], [1], [0], [0], [0, 0, 1, 0], [], []>} : vector<8x8xf32>, vector<8x8xf32>, vector<8x8xf32> -> vector<8x8xf32>
    %cst_20 = arith.constant dense<0xFF800000> : vector<8xf32>
    %35 = vector.multi_reduction <maximumf>, %34, %cst_20 [1] : vector<8x8xf32> to vector<8xf32>
    %36 = vector.shape_cast %35 : vector<8xf32> to vector<8x1xf32>
    %37 = vector.broadcast %36 : vector<8x1xf32> to vector<8x8xf32>
    %38 = arith.subf %34, %37 : vector<8x8xf32>
    %39 = math.exp %38 : vector<8x8xf32>
    %cst_21 = arith.constant dense<0.000000e+00> : vector<8xf32>
    %40 = vector.multi_reduction <add>, %39, %cst_21 [1] : vector<8x8xf32> to vector<8xf32>
    %41 = vector.shape_cast %40 : vector<8xf32> to vector<8x1xf32>
    %42 = tpu.reciprocal %41 {approx = true} : vector<8x1xf32> -> vector<8x1xf32>
    %43 = vector.broadcast %42 : vector<8x1xf32> to vector<8x8xf32>
    %44 = arith.mulf %39, %43 : vector<8x8xf32>
    %cst_22 = arith.constant dense<0.000000e+00> : vector<8x8xf32>
    %45 = tpu.matmul %44, %33, %cst_22 {dimension_numbers = #tpu.dot_dimension_numbers<[1], [0], [0], [1], [0, 0, 1, 1], [], []>} : vector<8x8xf32>, vector<8x8xf32>, vector<8x8xf32> -> vector<8x8xf32>
    %46 = vector.extract_strided_slice %15 {offsets = [0, 16], sizes = [8, 8], strides = [1, 1]} : vector<8x32xf32> to vector<8x8xf32>
    %47 = vector.extract_strided_slice %13 {offsets = [0, 32], sizes = [8, 8], strides = [1, 1]} : vector<8x64xf32> to vector<8x8xf32>
    %48 = vector.extract_strided_slice %13 {offsets = [0, 40], sizes = [8, 8], strides = [1, 1]} : vector<8x64xf32> to vector<8x8xf32>
    %cst_23 = arith.constant dense<0.000000e+00> : vector<8x8xf32>
    %49 = tpu.matmul %46, %47, %cst_23 {dimension_numbers = #tpu.dot_dimension_numbers<[1], [1], [0], [0], [0, 0, 1, 0], [], []>} : vector<8x8xf32>, vector<8x8xf32>, vector<8x8xf32> -> vector<8x8xf32>
    %cst_24 = arith.constant dense<0xFF800000> : vector<8xf32>
    %50 = vector.multi_reduction <maximumf>, %49, %cst_24 [1] : vector<8x8xf32> to vector<8xf32>
    %51 = vector.shape_cast %50 : vector<8xf32> to vector<8x1xf32>
    %52 = vector.broadcast %51 : vector<8x1xf32> to vector<8x8xf32>
    %53 = arith.subf %49, %52 : vector<8x8xf32>
    %54 = math.exp %53 : vector<8x8xf32>
    %cst_25 = arith.constant dense<0.000000e+00> : vector<8xf32>
    %55 = vector.multi_reduction <add>, %54, %cst_25 [1] : vector<8x8xf32> to vector<8xf32>
    %56 = vector.shape_cast %55 : vector<8xf32> to vector<8x1xf32>
    %57 = tpu.reciprocal %56 {approx = true} : vector<8x1xf32> -> vector<8x1xf32>
    %58 = vector.broadcast %57 : vector<8x1xf32> to vector<8x8xf32>
    %59 = arith.mulf %54, %58 : vector<8x8xf32>
    %cst_26 = arith.constant dense<0.000000e+00> : vector<8x8xf32>
    %60 = tpu.matmul %59, %48, %cst_26 {dimension_numbers = #tpu.dot_dimension_numbers<[1], [0], [0], [1], [0, 0, 1, 1], [], []>} : vector<8x8xf32>, vector<8x8xf32>, vector<8x8xf32> -> vector<8x8xf32>
    %61 = vector.extract_strided_slice %15 {offsets = [0, 24], sizes = [8, 8], strides = [1, 1]} : vector<8x32xf32> to vector<8x8xf32>
    %62 = vector.extract_strided_slice %13 {offsets = [0, 48], sizes = [8, 8], strides = [1, 1]} : vector<8x64xf32> to vector<8x8xf32>
    %63 = vector.extract_strided_slice %13 {offsets = [0, 56], sizes = [8, 8], strides = [1, 1]} : vector<8x64xf32> to vector<8x8xf32>
    %cst_27 = arith.constant dense<0.000000e+00> : vector<8x8xf32>
    %64 = tpu.matmul %61, %62, %cst_27 {dimension_numbers = #tpu.dot_dimension_numbers<[1], [1], [0], [0], [0, 0, 1, 0], [], []>} : vector<8x8xf32>, vector<8x8xf32>, vector<8x8xf32> -> vector<8x8xf32>
    %cst_28 = arith.constant dense<0xFF800000> : vector<8xf32>
    %65 = vector.multi_reduction <maximumf>, %64, %cst_28 [1] : vector<8x8xf32> to vector<8xf32>
    %66 = vector.shape_cast %65 : vector<8xf32> to vector<8x1xf32>
    %67 = vector.broadcast %66 : vector<8x1xf32> to vector<8x8xf32>
    %68 = arith.subf %64, %67 : vector<8x8xf32>
    %69 = math.exp %68 : vector<8x8xf32>
    %cst_29 = arith.constant dense<0.000000e+00> : vector<8xf32>
    %70 = vector.multi_reduction <add>, %69, %cst_29 [1] : vector<8x8xf32> to vector<8xf32>
    %71 = vector.shape_cast %70 : vector<8xf32> to vector<8x1xf32>
    %72 = tpu.reciprocal %71 {approx = true} : vector<8x1xf32> -> vector<8x1xf32>
    %73 = vector.broadcast %72 : vector<8x1xf32> to vector<8x8xf32>
    %74 = arith.mulf %69, %73 : vector<8x8xf32>
    %cst_30 = arith.constant dense<0.000000e+00> : vector<8x8xf32>
    %75 = tpu.matmul %74, %63, %cst_30 {dimension_numbers = #tpu.dot_dimension_numbers<[1], [0], [0], [1], [0, 0, 1, 1], [], []>} : vector<8x8xf32>, vector<8x8xf32>, vector<8x8xf32> -> vector<8x8xf32>
    %76 = tpu.concatenate %30, %45, %60, %75 in 1 : vector<8x8xf32>, vector<8x8xf32>, vector<8x8xf32>, vector<8x8xf32> -> vector<8x32xf32>
    %c0_31 = arith.constant 0 : index
    %c0_32 = arith.constant 0 : index
    %c0_33 = arith.constant 0 : index
    %77 = vector.load %arg7[%c0_31, %c0_32, %c0_33] : memref<1x8x32xf32, #tpu.memory_space<vmem>>, vector<1x8x32xf32>
    %78 = vector.shape_cast %77 : vector<1x8x32xf32> to vector<8x32xf32>
    %79 = vector.shape_cast %76 : vector<8x32xf32> to vector<1x8x32xf32>
    tpu.vector_store %arg7[%c0_31, %c0_32, %c0_33], %79 {strides = array<i32>} : memref<1x8x32xf32, #tpu.memory_space<vmem>>, vector<1x8x32xf32>,
    return
  }
  func.func @transform_0(%arg0: i32) -> (i32, i32, i32) {
    %c0_i32 = arith.constant 0 : i32
    %c0_i32_0 = arith.constant 0 : i32
    %c0_i32_1 = arith.constant 0 : i32
    return %arg0, %c0_i32, %c0_i32_0 : i32, i32, i32
  }
  func.func @transform_1(%arg0: i32) -> (i32, i32, i32) {
    %c0_i32 = arith.constant 0 : i32
    %c0_i32_0 = arith.constant 0 : i32
    %c0_i32_1 = arith.constant 0 : i32
    return %arg0, %c0_i32, %c0_i32_0 : i32, i32, i32
  }
  func.func @transform_2(%arg0: i32) -> (i32, i32) {
    %c0_i32 = arith.constant 0 : i32
    %c0_i32_0 = arith.constant 0 : i32
    %c0_i32_1 = arith.constant 0 : i32
    return %c0_i32, %c0_i32_0 : i32, i32
  }
  func.func @transform_3(%arg0: i32) -> (i32, i32) {
    %c0_i32 = arith.constant 0 : i32
    %c0_i32_0 = arith.constant 0 : i32
    %c0_i32_1 = arith.constant 0 : i32
    return %c0_i32, %c0_i32_0 : i32, i32
  }
  func.func @transform_4(%arg0: i32) -> (i32, i32) {
    %c0_i32 = arith.constant 0 : i32
    %c0_i32_0 = arith.constant 0 : i32
    %c0_i32_1 = arith.constant 0 : i32
    return %c0_i32, %c0_i32_0 : i32, i32
  }
  func.func @transform_5(%arg0: i32) -> (i32, i32) {
    %c0_i32 = arith.constant 0 : i32
    %c0_i32_0 = arith.constant 0 : i32
    %c0_i32_1 = arith.constant 0 : i32
    return %c0_i32, %c0_i32_0 : i32, i32
  }
  func.func @transform_6(%arg0: i32) -> (i32, i32, i32) {
    %c0_i32 = arith.constant 0 : i32
    %c0_i32_0 = arith.constant 0 : i32
    %c0_i32_1 = arith.constant 0 : i32
    return %arg0, %c0_i32, %c0_i32_0 : i32, i32, i32
  }
}

</mosaic_0001>

<bundles_post_ra>
// kernel: tpu_custom_call.1
= control target key start
LH: loop header
LB: loop body
LE: loop exit
PB: predicated region body
PF: predicated region fallthrough
CT: control target
= control target key end

     0   :  { %s2084_s0 = inlined_call_operand.hbm [shape: f32[2,8,32], index: 0, kind: input, shape index: {}]   ;;  %s2085_s1 = inlined_call_operand.hbm [shape: f32[2,8,32], index: 1, kind: input, shape index: {}]   ;;  %s2086_s2 = inlined_call_operand.hbm [shape: f32[32,32], index: 2, kind: input, shape index: {}]   ;;  %s2087_s3 = inlined_call_operand.vmem [shape: f32[1,32], index: 3, kind: input, shape index: {}]   ;;  %s2088_s4 = inlined_call_operand.hbm [shape: f32[32,64], index: 4, kind: input, shape index: {}]   ;;  %s2089_s5 = inlined_call_operand.vmem [shape: f32[1,64], index: 5, kind: input, shape index: {}]   ;;  %s2090_s6 = inlined_call_operand.hbm [shape: f32[2,8,32], index: 6, kind: output, shape index: {}]  }
   0x1   :  { %2095 = sst [smem:[#allocation17_spill]] %s2086_s2 }
   0x2   :  { %2096 = sst [smem:[#allocation18_spill]] %s2088_s4 }
   0x3   :  { %11 = vsyncpa [#allocation3], 0 }
   0x4   :  { %13 = vsyncpa [#allocation3 + $0x1], 0 }
   0x5   :  { %14 = vsyncpa [#allocation6], 0 }
   0x6   :  { %16 = vsyncpa [#allocation6 + $0x1], 0 }
   0x7   :  { %17 = vsyncpa [#allocation9], 0 }
   0x8   :  { %18 = vsyncpa [#allocation4], 0 }
   0x9   :  { %20 = vsyncpa [#allocation4 + $0x1], 0  ;;  %s1773_s21 = smov 0   ;;  %s1775_s22 = smov 0  }
   0xa   :  { %s1777_s23 = smov 0   ;;  %s1779_s24 = smov 0  }
   0xb LB: > { %s1794_s25 = sadd.s32 4294967295, %s1717_s24   ;;  %s1308_s26 = sadd.s32 4294967294, %s1717_s24   ;;  %s1717_s24 = sphi %s1779_s24, %s2120_s24   ;;  %s1713_s23 = sphi %s1777_s23, %s2119_s23   ;;  %s1709_s22 = sphi %s1775_s22, %s2118_s22   ;;  %s1705_s21 = sphi %s1773_s21, %s2117_s21  }
   0xc   : > { %p46_p0 = scmp.ne.s32.totalorder %s1709_s22, %s1705_s21  ;;  %p2091_p1 = scmp.eq.s32.totalorder %s1794_s25, 0 }
   0xd   : > { %p186_p3 = scmp.eq.s32.totalorder %s1308_s26, 1  ;;  %p1309_p5 = scmp.ge.s32.totalorder %s1717_s24, 1 }
   0xe   : > { %p1803_p4 = por %p2091_p1, %p46_p0  ;;  %p193_p7 = scmp.lt.s32.totalorder %s1717_s24, 3 }
   0xf   : > { %p1808_p6 = por %p186_p3, %p46_p0  ;;  %s1719_s30 = smov [#allocation7]  }
  0x10   : > { %s2097_s27 = scalar_select %p1803_p4, 1, 0 }
  0x11   : > { %s2098_s28 = scalar_select %p1808_p6, 1, 0 }
  0x12   : > { %p1813_p8 = pnand %p1309_p5, %p193_p7  ;;  %s205_s7 = sshll.u32 %s1719_s30, 4  ;;  %s206_s7 = int_to_ptr.vmem [resolvable:$true] %s205_s7 }
  0x13   : > { %s1720_s9 = smov [#allocation8]   ;;  %s1544_s11 = scalar_lea.vmem %s206_s7, 512 }
  0x14   : > { %s2099_s29 = scalar_select %p1813_p8, 1, 0 }
  0x15   : > { %p1445_p9 = pneg %p1813_p8  ;;  %s221_s10 = sshll.u32 %s1720_s9, 4  ;;  %s222_s10 = int_to_ptr.vmem [resolvable:$true] %s221_s10 }
  0x16   : > { %p1545_p13 = scmp.ne.s32.totalorder %s206_s7, %s1544_s11  ;;  %p1552_p5 = scmp.lt.s32.totalorder %s206_s7, %s206_s7 }
  0x17   : > { %p1822_p11 = pnand %p1445_p9, %p2091_p1  ;;  %p1553_p7 = scmp.lt.s32.totalorder %s1544_s11, %s1544_s11 }
  0x19   : > { %p1535_p12 = pneg %p1822_p11  ;;  %p1554_p10 = por %p1553_p7, %p1552_p5 }
  0x1b   : > { %p1547_p0 = pnand %p1545_p13, %p1535_p12 }
  0x1d   : > { %p1548_p3 = pneg %p1547_p0 }
  0x1f   : > { %p1555_p9 = pnand %p1554_p10, %p1548_p3 }
  0x21   : > { %1558 = shalt.err (!%p1555_p9)
}
  0x22   : > { %s1721_s12 = smov 128   ;;  %s1722_s13 = smov 8  }
  0x23   : > { %s2101_s2 = sld [smem:[#allocation17_spill]]  ;;  %s1570_s16 = scalar_lea.vmem %s222_s10, 512 }
  0x24   : > { %p1571_p1 = scmp.ne.s32.totalorder %s222_s10, %s1570_s16  ;;  %p1578_p2 = scmp.lt.s32.totalorder %s222_s10, %s222_s10 }
  0x25   : > { %p1579_p6 = scmp.lt.s32.totalorder %s1570_s16, %s1570_s16 }
  0x26   : > { %p1573_p13 = pnand %p1571_p1, %p1535_p12 }
  0x27   : > { %p1580_p5 = por %p1579_p6, %p1578_p2 }
  0x28   : > { %p1574_p0 = pneg %p1573_p13 }
  0x29   : > { %1448 = dma.hbm_to_vmem [thread:$0]  (!%p1822_p11), %s2101_s2, 512, %s206_s7, [#allocation6], %s1721_s12, %s1721_s12, %s1722_s13  }
  0x2a   : > { %p1581_p10 = pnand %p1580_p5, %p1574_p0 }
  0x2c   : > { %1584 = shalt.err (!%p1581_p10)
}
  0x2d   : > { %s2102_s4 = sld [smem:[#allocation18_spill]]  ;;  %s1845_s19 = sadd.s32 1, %s1717_s24  }
  0x2e   : > { %s33_s20 = sadd.s32 1, %s1713_s23  ;;  %s30_s26 = ssub.s32 %s1717_s24, %s1845_s19 }
  0x2f   : > { %p40_p1 = scmp.ne.s32.totalorder %s1713_s23, %s1709_s22  ;;  %p31_p2 = scmp.eq.s32.totalorder %s30_s26, 0 }
  0x30   : > { %p41_p6 = scmp.eq.s32.totalorder %s1717_s24, 0  ;;  %p2103_p12 = scmp.eq.s32.totalorder %s1794_s25, 1 }
  0x31   : > { %p1465_p7 = scmp.lt.s32.totalorder %s1717_s24, 2  ;;  %s238_s8 = sand.u32 1, %s1713_s23  }
  0x32   : > { %p1855_p3 = por %p2103_p12, %p40_p1  ;;  %p42_p9 = por %p41_p6, %p40_p1 }
  0x33   : > { %1451 = dma.hbm_to_vmem [thread:$0]  (!%p1822_p11), %s2102_s4, 512, %s222_s10, [#allocation9], %s1721_s12, %s1721_s12, %s1722_s13  }
  0x34   : > { %s2104_s30 = scalar_select %p1855_p3, 1, 0 }
  0x35   : > { %s1861_s7 = scalar_select %p31_p2, %s1713_s23, %s33_s20  }
  0x36   : > { %s1864_s9 = sshll.u32 %s238_s8, 3  ;;  %s1314_s10 = sshll.u32 %s1717_s24, 7 }
  0x37   : > { %2105 = sst [smem:[#allocation16_spill]] %s1861_s7  ;;  %s1870_s13 = scalar_lea.hbm %s2084_s0, %s1314_s10 }
  0x38   : > { %s242_s14 = scalar_lea.vmem [#allocation2], %s1864_s9  ;;  %p1875_p11 = pnand %p1465_p7, %p42_p9 }
  0x39   : > { %s249_s15 = sshll.u32 %s242_s14, 4  ;;  %s1882_s20 = scalar_lea.hbm %s2085_s1, %s1314_s10  ;;  %s1873_s15 = int_to_ptr.vmem [resolvable:$true] %s249_s15 }
  0x3a   : > { %s256_s26 = sand.u32 1, %s1717_s24   ;;  %s239_s11 = scalar_lea.sflag [#allocation3], %s238_s8 }
  0x3b   : > { %s1585_s12 = scalar_lea.hbm %s1870_s13, 128  ;;  %p1587_p0 = pneg %p1875_p11 }
  0x3c   : > { %p1586_p13 = scmp.ne.s32.totalorder %s1870_s13, %s1585_s12  ;;  %s1590_s4 = scalar_lea.hbm %s2084_s0, 256 }
  0x3d   : > { %p1591_p1 = scmp.lt.s32.totalorder %s1870_s13, %s2084_s0  ;;  %p1592_p2 = scmp.lt.s32.totalorder %s1590_s4, %s1585_s12 }
  0x3e   : > { %p1588_p5 = pnand %p1587_p0, %p1586_p13 }
  0x3f   : > { %p1593_p6 = por %p1592_p2, %p1591_p1 }
  0x40   : > { %p1589_p10 = pneg %p1588_p5 }
  0x42   : > { %p1594_p12 = pnand %p1593_p6, %p1589_p10 }
  0x44   : > { %1597 = shalt.err (!%p1594_p12)
}
  0x45   : > { %s1598_s8 = scalar_lea.vmem %s1873_s15, 128  ;;  %s1723_s2 = smov [#allocation2]  }
  0x46   : > { %p1599_p7 = scmp.ne.s32.totalorder %s1873_s15, %s1598_s8  ;;  %s1603_s10 = sshll.u32 %s1723_s2, 4  ;;  %s1604_s10 = int_to_ptr.vmem [resolvable:$false] %s1603_s10 }
  0x47   : > { %s1605_s18 = scalar_lea.vmem %s1604_s10, 256  ;;  %p1606_p5 = scmp.lt.s32.totalorder %s1873_s15, %s1604_s10 }
  0x48   : > { %p1601_p9 = pnand %p1599_p7, %p1587_p0  ;;  %p1607_p3 = scmp.lt.s32.totalorder %s1605_s18, %s1598_s8 }
  0x4a   : > { %p1602_p13 = pneg %p1601_p9  ;;  %p1608_p4 = por %p1607_p3, %p1606_p5 }
  0x4c   : > { %p1609_p1 = pnand %p1608_p4, %p1602_p13 }
  0x4e   : > { %1612 = shalt.err (!%p1609_p1)
}
  0x4f   : > { %1455 = dma.hbm_to_vmem [thread:$0]  (!%p1875_p11), %s1870_s13, 128, %s1873_s15, %s239_s11  }
  0x50   : > { %s260_s4 = scalar_lea.vmem [#allocation5], %s1864_s9  ;;  %s257_s12 = scalar_lea.sflag [#allocation6], %s256_s26 }
  0x51   : > { %s267_s7 = sshll.u32 %s260_s4, 4  ;;  %s1613_s14 = scalar_lea.hbm %s1882_s20, 128  ;;  %s268_s7 = int_to_ptr.vmem [resolvable:$true] %s267_s7 }
  0x52   : > { %p1614_p3 = scmp.ne.s32.totalorder %s1882_s20, %s1613_s14  ;;  %s1618_s2 = scalar_lea.hbm %s2085_s1, 256 }
  0x53   : > { %p1619_p2 = scmp.lt.s32.totalorder %s1882_s20, %s2085_s1  ;;  %p1620_p6 = scmp.lt.s32.totalorder %s1618_s2, %s1613_s14 }
  0x54   : > { %p1616_p4 = pnand %p1614_p3, %p1587_p0 }
  0x55   : > { %p1621_p12 = por %p1620_p6, %p1619_p2 }
  0x56   : > { %p1617_p10 = pneg %p1616_p4 }
  0x58   : > { %p1622_p7 = pnand %p1621_p12, %p1617_p10 }
  0x5a   : > { %1625 = shalt.err (!%p1622_p7)
}
  0x5b   : > { %s1626_s9 = scalar_lea.vmem %s268_s7, 128  ;;  %s1724_s13 = smov [#allocation5]  }
  0x5c   : > { %p1627_p9 = scmp.ne.s32.totalorder %s268_s7, %s1626_s9  ;;  %s1631_s15 = sshll.u32 %s1724_s13, 4  ;;  %s1632_s15 = int_to_ptr.vmem [resolvable:$false] %s1631_s15 }
  0x5d   : > { %s1633_s26 = scalar_lea.vmem %s1632_s15, 256  ;;  %p1634_p1 = scmp.lt.s32.totalorder %s268_s7, %s1632_s15 }
  0x5e   : > { %p1629_p13 = pnand %p1627_p9, %p1587_p0  ;;  %p1635_p3 = scmp.lt.s32.totalorder %s1633_s26, %s1626_s9 }
  0x60   : > { %p1630_p5 = pneg %p1629_p13  ;;  %p1636_p4 = por %p1635_p3, %p1634_p1 }
  0x62   : > { %p1637_p8 = pnand %p1636_p4, %p1630_p5 }
  0x64   : > { %1640 = shalt.err (!%p1637_p8)
}
  0x65   : > { %1458 = dma.hbm_to_vmem [thread:$0]  (!%p1875_p11), %s1882_s20, 128, %s268_s7, %s257_s12  }
  0x66   : > { %p2107_p10 = scmp.ne.s32.totalorder %s2099_s29, 0 }
  0x67   : > { %s1933_s11 = sand.u32 (!%p2107_p10), 1, %s1709_s22   ;;  %p2108_p0 = scmp.ne.s32.totalorder (!%p2107_p10), %s2097_s27, 0 }
  0x68   : > { %276 = sbr.rel (%p2107_p10) target bundleno = 1279 (0x4ff), region = 44  ;;  %s1936_s4 = sshll.u32 (!%p2107_p10), %s1933_s11, 3 }
  0x69   : > { %s279_s14 = scalar_lea.sflag (!%p2107_p10), [#allocation3], %s1933_s11  ;;  %s282_s17 = scalar_lea.vmem (!%p2107_p10), [#allocation2], %s1936_s4 }
  0x6d   : > { %1684 = dma.done.wait (%p2108_p0), %s279_s14, 128  }
  0x6e   : > { %1686 = vsyncadd (%p2108_p0), %s279_s14, 4294967168  ;;  %s287_s29 = sand.u32 1, %s1794_s25   ;;  %s291_s20 = scalar_lea.vmem [#allocation5], %s1936_s4 }
  0x6f   : > { %s288_s16 = scalar_lea.sflag [#allocation6], %s287_s29 }
  0x70   : > { %1688 = dma.done.wait (%p2108_p0), %s288_s16, 128  }
  0x71   : > { %1690 = vsyncadd (%p2108_p0), %s288_s16, 4294967168  ;;  %p2109_p8 = scmp.eq.s32.totalorder %s1794_s25, 0 }
  0x73   : > { %1692 = dma.done.wait (%p2109_p8), [#allocation6], 512   ;;  %p2110_p11 = pmov %p2109_p8 }
  0x74   : > { %p2111_p2 = pmov %p2109_p8 }
  0x75   : > { %1694 = vsyncadd (%p2110_p11), [#allocation6], 4294966784 }
  0x76   : > { %1696 = dma.done.wait (%p2111_p2), [#allocation9], 512   ;;  %p2112_p6 = pmov %p2111_p2 }
  0x77   : > { %v1725_v0 = vmov 0.0   ;;  %vm1726_vm0 = vmmov 0   ;;  %v338_v1 = vld [vmem:[#allocation7 + $0x18] sm:$0xff]  ;;  %v337_v3 = vld [vmem:[#allocation7 + $0x10] sm:$0xff]  ;;  %v336_v5 = vld [vmem:[#allocation7 + $0x8] sm:$0xff]  ;;  %vm346_vm1 = vcmask 261120  }
  0x78   : > { %1698 = vsyncadd (%p2112_p6), [#allocation9], 4294966784  ;;  %1369 = vmatprep.subr.mxu0 %v1725_v0  ;;  %1380 = vmatprep.subr.mxu1 %v1725_v0  ;;  %v423_v2 = vld [vmem:[#allocation8 + $0x18] sm:$0xff]  ;;  %v422_v4 = vld [vmem:[#allocation8 + $0x10] sm:$0xff]  ;;  %vm505_vm2 = vcmask 64512   ;;  %s1727_s2 = smov 96  }
  0x79   : > { %1377 = vmatprep.mubr.msk.f32.mxu0 %vm1726_vm0, %v1725_v0  ;;  %1388 = vmatprep.mubr.msk.f32.mxu1 %vm1726_vm0, %v1725_v0  ;;  %v421_v6 = vld [vmem:[#allocation8 + $0x8] sm:$0xff]  ;;  %v335_v7 = vld [vmem:[#allocation7] sm:$0xff]  ;;  %v334_v10 = vld [vmem:[%s291_s20] sm:$0xff]  ;;  %s1728_s10 = smov 112   ;;  %s1729_s18 = smov 120   ;;  %vm1177_vm3 = vcmask 130048  }
  0x7a   : > { %1370 = vmatpush3.msra.mxu0 %v338_v1  ;;  %1381 = vmatpush3.msra.mxu1 %v423_v2  ;;  %v420_v8 = vld [vmem:[#allocation8] sm:$0xff]  ;;  %s1730_s9 = smov 104   ;;  %s1731_s13 = smov 80   ;;  %vm1179_vm4 = vcmask 195584  }
  0x7b   : > { %1371 = vmatprep.subr.mxu0 %v1725_v0  ;;  %1382 = vmatprep.subr.mxu1 %v1725_v0  ;;  %v333_v9 = vld [vmem:[%s282_s17] sm:$0xff]  ;;  %s1732_s15 = smov 88   ;;  %s1733_s26 = smov 72  }
  0x7c   : > { %1372 = vmatpush3.msra.mxu0 %v337_v3  ;;  %1383 = vmatpush3.msra.mxu1 %v422_v4  ;;  %v1323_v11 = vld [vmem:[%s2087_s3] ss:$0 sm:$0xff]  ;;  %s1734_s14 = smov 8   ;;  %s1735_s17 = smov 16  }
  0x7d   : > { %1373 = vmatprep.subr.mxu0 %v1725_v0  ;;  %1384 = vmatprep.subr.mxu1 %v1725_v0  ;;  %v1325_v12 = vld [vmem:[%s2089_s5] ss:$0 sm:$0xff]  ;;  %s1736_s29 = smov 24   ;;  %s1340_s16 = sshll.u32 %s1794_s25, 7 }
  0x7e   : > { %1374 = vmatpush3.msra.mxu0 %v336_v5  ;;  %1385 = vmatpush3.msra.mxu1 %v421_v6  ;;  %s332_s20 = scalar_lea.vmem [#allocation10], %s1936_s4  ;;  %s2046_s8 = scalar_lea.hbm %s2090_s6, %s1340_s16 }
  0x7f   : > { %1375 = vmatprep.subr.mxu0 %v1725_v0  ;;  %1386 = vmatprep.subr.mxu1 %v1725_v0  ;;  %s1196_s27 = sshll.u32 %s332_s20, 4  ;;  %p2113_p7 = scmp.ne.s32.totalorder %s2104_s30, 0  ;;  %s1197_s27 = int_to_ptr.vmem [resolvable:$true] %s1196_s27 }
  0x80   : > { %1376 = vmatpush3.msra.mxu0 %v335_v7  ;;  %1387 = vmatpush3.msra.mxu1 %v420_v8  ;;  %s1737_s25 = smov [#allocation10]  }
  0x81   : > { %1378 = vmatmul.mubr.msk.f32.vlgmr.msra.gmra.mxu0 %vm346_vm1, %v333_v9  ;;  %1389 = vmatmul.mubr.msk.f32.vlgmr.msra.gmra.mxu1 %vm346_vm1, %v334_v10  ;;  %s1645_s4 = sshll.u32 %s1737_s25, 4  ;;  %s1646_s4 = int_to_ptr.vmem [resolvable:$false] %s1645_s4 }
  0x82   : > { %1391 = vmatprep.subr.mxu0 %v1725_v0  ;;  %1393 = vmatprep.mubr.msk.f32.mxu0 %vm1726_vm0, %v1725_v0  ;;  %p1648_p5 = scmp.lt.s32.totalorder %s1197_s27, %s1646_s4 }
  0x83   : > { %1396 = vmatprep.subr.mxu1 %v1725_v0  ;;  %1398 = vmatprep.mubr.msk.f32.mxu1 %vm1726_vm0, %v1725_v0 }
 0x141   : > { %v416_v13 = vpop.f32.mrf.mxu0  ;;  %v500_v14 = vpop.f32.mrf.mxu1 }
 0x142   : > { %v417_v15 = vadd.f32 %v1323_v11, %v416_v13  ;;  %v1988_v16 = vadd.f32 %v1325_v12, %v500_v14 }
 0x143   : > { %v1379_v17 = vpop.f32.mrf.mxu0  ;;  %v1390_v18 = vpop.f32.mrf.mxu1 }
 0x144   : > { %v504_v19 = vmul.f32 0.35355338, %v417_v15  ;;  %836 = vrot.lane.b32.xlu1 %v1988_v16, %s1727_s2  ;;  %671 = vrot.lane.b32.xlu0 %v1988_v16, %s1728_s10  ;;  %s1183_s2 = scalar_lea.sflag [#allocation4], %s1933_s11 }
 0x145   : > { %1392 = vmatpush3.xpose.msk.msra.mxu0 %vm505_vm2, %v1988_v16 }
 0x146   : > { %1401 = vmatprep.subr.mxu0 %v1725_v0 }
 0x148   : > { %1394 = vmatmul.mubr.msk.f32.vlgmr.msra.gmra.mxu0 %vm505_vm2, %v504_v19  ;;  %834 = vrot.lane.b32.xlu1 %v504_v19, %s1728_s10  ;;  %s1641_s10 = scalar_lea.vmem %s1197_s27, 128 }
 0x149   : > { %669 = vrot.lane.b32.xlu0 %v504_v19, %s1729_s18  ;;  %1403 = vmatprep.mubr.msk.f32.mxu0 %vm1726_vm0, %v1725_v0  ;;  %p1642_p12 = scmp.ne.s32.totalorder %s1197_s27, %s1641_s10 }
 0x14b   : > { %p1643_p9 = pnand %p1642_p12, %p2113_p7 }
 0x14c   : > { %999 = vrot.lane.b32.xlu1 %v504_v19, %s1730_s9 }
 0x14d   : > { %1001 = vrot.lane.b32.xlu0 %v1988_v16, %s1731_s13  ;;  %p1644_p13 = pneg %p1643_p9 }
 0x1b6   : > { %v672_v20 = vpop.permute.xlu0 %671  ;;  %v837_v21 = vpop.permute.xlu1 %836 }
 0x1b7   : > { %1402 = vmatpush3.xpose.msk.msra.mxu0 %vm505_vm2, %v672_v20 }
 0x1b8   : > { %1411 = vmatprep.subr.mxu0 %v1725_v0 }
 0x1ba   : > { %v835_v23 = vpop.permute.xlu1 %834 }
 0x1bb   : > { %v670_v22 = vpop.permute.xlu0 %669 }
 0x1bc   : > { %1404 = vmatmul.mubr.msk.f32.vlgmr.msra.gmra.mxu0 %vm505_vm2, %v670_v22 }
 0x1bd   : > { %1412 = vmatpush3.xpose.msk.msra.mxu0 %vm505_vm2, %v837_v21  ;;  %1413 = vmatprep.mubr.msk.f32.mxu0 %vm1726_vm0, %v1725_v0 }
 0x1be   : > { %1421 = vmatprep.subr.mxu0 %v1725_v0  ;;  %v1000_v25 = vpop.permute.xlu1 %999 }
 0x1bf   : > { %v1002_v24 = vpop.permute.xlu0 %1001 }
 0x1c0   : > { %1414 = vmatmul.mubr.msk.f32.vlgmr.msra.gmra.mxu0 %vm505_vm2, %v835_v23 }
 0x1c1   : > { %1422 = vmatpush3.xpose.msk.msra.mxu0 %vm505_vm2, %v1002_v24  ;;  %1423 = vmatprep.mubr.msk.f32.mxu0 %vm1726_vm0, %v1725_v0 }
 0x1c4   : > { %1424 = vmatmul.mubr.msk.f32.vlgmr.msra.gmra.mxu0 %vm505_vm2, %v1000_v25 }
 0x208   : > { %v578_v26 = vpop.f32.mrf.mxu0 }
 0x209   : > { %v582_v27 = vsel %vm505_vm2, %v578_v26, -inf }
 0x20a   : > { %583 = vmax.xlane.f32.xlu0 %v582_v27  ;;  %v1395_v28 = vpop.f32.mrf.mxu0 }
 0x27c   : > { %v743_v29 = vpop.f32.mrf.mxu0 }
 0x27d   : > { %v747_v30 = vsel %vm505_vm2, %v743_v29, -inf }
 0x27e   : > { %748 = vmax.xlane.f32.xlu1 %v747_v30  ;;  %v1405_v31 = vpop.f32.mrf.mxu0 }
 0x280   : > { %v908_v32 = vpop.f32.mrf.mxu0 }
 0x281   : > { %v912_v33 = vsel %vm505_vm2, %v908_v32, -inf }
 0x282   : > { %913 = vmax.xlane.f32.xlu0 %v912_v33  ;;  %v1415_v34 = vpop.f32.mrf.mxu0 }
 0x284   : > { %v1073_v35 = vpop.f32.mrf.mxu0 }
 0x285   : > { %v1077_v36 = vsel %vm505_vm2, %v1073_v35, -inf }
 0x286   : > { %1078 = vmax.xlane.f32.xlu0 %v1077_v36  ;;  %v1425_v37 = vpop.f32.mrf.mxu0 }
 0x28f   : > { %593 = vrot.lane.b32.xlu1 %v1988_v16, %s1729_s18  ;;  %s1647_s18 = scalar_lea.vmem %s1646_s4, 256 }
 0x290   : > { %p1649_p1 = scmp.lt.s32.totalorder %s1647_s18, %s1641_s10 }
 0x292   : > { %p1650_p3 = por %p1649_p1, %p1648_p5 }
 0x293   : > { %v584_v38 = vpop.xlane.xlu0 %583 }
 0x294   : > { %v585_v39 = vsub.f32 %v578_v26, %v584_v38  ;;  %p1651_p4 = pnand %p1650_p3, %p1644_p13 }
 0x296   : > { %v586_v40 = vmul.f32 1.442695, %v585_v39 }
 0x298   : > { %1517 = vpow2.f32 %v586_v40 }
 0x2a5   : > { %v1518_v41 = vpop.eup %1517 }
 0x2a6   : > { %v588_v42 = vsel %vm505_vm2, %v1518_v41, 0.0 }
 0x2b3   : > { %589 = vadd.xlane.f32.xlu1 %v588_v42 }
 0x307   : > { %v749_v43 = vpop.xlane.xlu1 %748 }
 0x308   : > { %v750_v44 = vsub.f32 %v743_v29, %v749_v43 }
 0x30a   : > { %v751_v45 = vmul.f32 1.442695, %v750_v44 }
 0x30b   : > { %v594_v46 = vpop.permute.xlu1 %593  ;;  %v914_v47 = vpop.xlane.xlu0 %913 }
 0x30c   : > { %1519 = vpow2.f32 %v751_v45  ;;  %v915_v48 = vsub.f32 %v908_v32, %v914_v47  ;;  %1397 = vmatpush3.msra.mxu1 %v594_v46 }
 0x30d   : > { %1406 = vmatprep.subr.mxu1 %v1725_v0 }
 0x30e   : > { %v916_v49 = vmul.f32 1.442695, %v915_v48 }
 0x30f   : > { %v1079_v50 = vpop.xlane.xlu0 %1078 }
 0x310   : > { %1521 = vpow2.f32 %v916_v49  ;;  %v1080_v51 = vsub.f32 %v1073_v35, %v1079_v50 }
 0x312   : > { %v1081_v52 = vmul.f32 1.442695, %v1080_v51 }
 0x314   : > { %1523 = vpow2.f32 %v1081_v52 }
 0x319   : > { %v1520_v53 = vpop.eup %1519 }
 0x31a   : > { %v753_v54 = vsel %vm505_vm2, %v1520_v53, 0.0 }
 0x31b   : > { %754 = vadd.xlane.f32.xlu0 %v753_v54 }
 0x31d   : > { %v1522_v55 = vpop.eup %1521 }
 0x31e   : > { %v918_v56 = vsel %vm505_vm2, %v1522_v55, 0.0 }
 0x31f   : > { %919 = vadd.xlane.f32.xlu1 %v918_v56 }
 0x321   : > { %v1524_v57 = vpop.eup %1523 }
 0x322   : > { %v1083_v58 = vsel %vm505_vm2, %v1524_v57, 0.0 }
 0x323   : > { %1084 = vadd.xlane.f32.xlu0 %v1083_v58 }
 0x330   : > { %923 = vrot.lane.b32.xlu1 %v1988_v16, %s1732_s15 }
 0x334   : > { %1088 = vrot.lane.b32.xlu1 %v1988_v16, %s1733_s26 }
 0x339   : > { %758 = vrot.lane.b32.xlu0 %v1988_v16, %s1730_s9 }
 0x33c   : > { %v590_v59 = vpop.xlane.xlu1 %589 }
 0x33d   : > { %1525 = vrcp.f32 %v590_v59 }
 0x34a   : > { %v1526_v60 = vpop.eup %1525 }
 0x34b   : > { %v592_v61 = vmul.f32 %v1526_v60, %v1518_v41 }
 0x34d   : > { %1399 = vmatmul.mubr.msk.f32.vlgmr.msra.gmra.mxu1 %vm505_vm2, %v592_v61 }
 0x34e   : > { %1408 = vmatprep.mubr.msk.f32.mxu1 %vm1726_vm0, %v1725_v0 }
 0x3a4   : > { %v755_v62 = vpop.xlane.xlu0 %754 }
 0x3a5   : > { %1527 = vrcp.f32 %v755_v62 }
 0x3a8   : > { %v920_v63 = vpop.xlane.xlu1 %919 }
 0x3a9   : > { %1529 = vrcp.f32 %v920_v63 }
 0x3ac   : > { %v1085_v1 = vpop.xlane.xlu0 %1084  ;;  %v924_v4 = vpop.permute.xlu1 %923 }
 0x3ad   : > { %1531 = vrcp.f32 %v1085_v1 }
 0x3b0   : > { %v759_v2 = vpop.permute.xlu0 %758  ;;  %v1089_v8 = vpop.permute.xlu1 %1088 }
 0x3b1   : > { %1407 = vmatpush3.msra.mxu1 %v759_v2 }
 0x3b2   : > { %v1528_v3 = vpop.eup %1527  ;;  %1416 = vmatprep.subr.mxu1 %v1725_v0 }
 0x3b3   : > { %v757_v5 = vmul.f32 %v1528_v3, %v1520_v53 }
 0x3b5   : > { %1409 = vmatmul.mubr.msk.f32.vlgmr.msra.gmra.mxu1 %vm505_vm2, %v757_v5 }
 0x3b6   : > { %v1530_v6 = vpop.eup %1529  ;;  %1417 = vmatpush3.msra.mxu1 %v924_v4  ;;  %1418 = vmatprep.mubr.msk.f32.mxu1 %vm1726_vm0, %v1725_v0 }
 0x3b7   : > { %1426 = vmatprep.subr.mxu1 %v1725_v0  ;;  %v922_v7 = vmul.f32 %v1530_v6, %v1522_v55 }
 0x3b9   : > { %1419 = vmatmul.mubr.msk.f32.vlgmr.msra.gmra.mxu1 %vm505_vm2, %v922_v7 }
 0x3ba   : > { %v1532_v9 = vpop.eup %1531  ;;  %1427 = vmatpush3.msra.mxu1 %v1089_v8  ;;  %1428 = vmatprep.mubr.msk.f32.mxu1 %vm1726_vm0, %v1725_v0 }
 0x3bb   : > { %v1087_v10 = vmul.f32 %v1532_v9, %v1524_v57 }
 0x3bd   : > { %1429 = vmatmul.mubr.msk.f32.vlgmr.msra.gmra.mxu1 %vm505_vm2, %v1087_v10 }
 0x40d   : > { %v665_v11 = vpop.f32.mrf.mxu1 }
 0x40f   : > { %v1400_v12 = vpop.f32.mrf.mxu1 }
 0x475   : > { %v830_v13 = vpop.f32.mrf.mxu1 }
 0x476   : > { %1165 = vrot.lane.b32.xlu0 %v830_v13, %s1734_s14 }
 0x477   : > { %v1410_v14 = vpop.f32.mrf.mxu1 }
 0x479   : > { %v995_v15 = vpop.f32.mrf.mxu1 }
 0x47a   : > { %1169 = vrot.lane.b32.xlu1 %v995_v15, %s1735_s17 }
 0x47b   : > { %v1420_v16 = vpop.f32.mrf.mxu1 }
 0x47d   : > { %v1160_v17 = vpop.f32.mrf.mxu1 }
 0x47e   : > { %1173 = vrot.lane.b32.xlu0 %v1160_v17, %s1736_s29 }
 0x47f   : > { %v1430_v0 = vpop.f32.mrf.mxu1 }
 0x4e8   : > { %v1166_v18 = vpop.permute.xlu0 %1165 }
 0x4e9   : > { %v1176_v20 = vsel %vm505_vm2, %v665_v11, %v1166_v18 }
 0x4ec   : > { %v1170_v19 = vpop.permute.xlu1 %1169 }
 0x4ed   : > { %v1178_v21 = vsel %vm1177_vm3, %v1176_v20, %v1170_v19 }
 0x4f0   : > { %v1174_v22 = vpop.permute.xlu0 %1173 }
 0x4f1   : > { %v1180_v23 = vsel %vm1179_vm4, %v1178_v21, %v1174_v22 }
 0x4f2   : > { %1181 = vst.msk [vmem:[%s332_s20] sm:$0xff] %vm346_vm1, %v1180_v23 }
 0x4f3   : > { %1654 = shalt.err (!%p1651_p4)
}
 0x4f4   : > { %s1655_s9 = scalar_lea.hbm %s2046_s8, 128  ;;  %s1659_s15 = scalar_lea.hbm %s2090_s6, 256 }
 0x4f5   : > { %p1656_p10 = scmp.ne.s32.totalorder %s2046_s8, %s1655_s9  ;;  %p1660_p11 = scmp.lt.s32.totalorder %s2046_s8, %s2090_s6 }
 0x4f6   : > { %p1661_p2 = scmp.lt.s32.totalorder %s1659_s15, %s1655_s9 }
 0x4f7   : > { %p1657_p0 = pnand %p1656_p10, %p2113_p7 }
 0x4f8   : > { %p1662_p6 = por %p1661_p2, %p1660_p11 }
 0x4f9   : > { %p1658_p8 = pneg %p1657_p0 }
 0x4fb   : > { %p1663_p12 = pnand %p1662_p6, %p1658_p8 }
 0x4fd   : > { %1666 = shalt.err (!%p1663_p12)
}
 0x4fe   : > { %1443 = dma.vmem_to_hbm [thread:$0]  (%p2113_p7), %s1197_s27, 128, %s2046_s8, %s1183_s2  }
 0x4ff PF: > { %s1208_s17 = sand.u32 1, %s1705_s21   ;;  %p2114_p9 = scmp.ne.s32.totalorder %s2098_s28, 0 }
 0x500   : > { %p2115_p13 = scmp.ge.s32.totalorder %s1717_s24, 2  ;;  %s1209_s29 = scalar_lea.sflag [#allocation4], %s1208_s17 }
 0x502   : > { %p1460_p5 = pnand %p2115_p13, %p2114_p9 }
 0x504   : > { %p1461_p1 = pneg %p1460_p5 }
 0x506   : > { %1700 = dma.done.wait (%p1461_p1), %s1209_s29, 128  }
 0x507   : > { %1702 = vsyncadd (%p1461_p1), %s1209_s29, 4294967168  ;;  %s2116_s16 = sld [smem:[#allocation16_spill]]  ;;  %p23_p3 = scmp.ge.s32.totalorder %s1845_s19, 4  }
 0x508   : > { %s2117_s21 = smov %s1709_s22  ;;  %s2118_s22 = smov %s1713_s23 }
 0x509   : > { %s2120_s24 = smov %s1845_s19  ;;  %25 = sbr.rel (!%p23_p3) target bundleno = 11 (0xb), region = 110 }
 0x50d   : > { %s2119_s23 = smov %s2116_s16 }
 0x50e   :  { %1214 = vsyncpa [#allocation3], 1 }
 0x50f   :  { %1216 = vsyncpa [#allocation3 + $0x1], 1 }
 0x510   :  { %1217 = vsyncpa [#allocation6], 1 }
 0x511   :  { %1219 = vsyncpa [#allocation6 + $0x1], 1 }
 0x512   :  { %1220 = vsyncpa [#allocation9], 1 }
 0x513   :  { %1221 = vsyncpa [#allocation4], 1 }
 0x514   :  { %1223 = vsyncpa [#allocation4 + $0x1], 1 }

</bundles_post_ra>
